<compile_context>
chip_gen: v7x
topology: tpu7x:2x2x1
jax: 0.10.0
libtpu: 0.0.40
codegen_flags: <defaults>
</compile_context>

<pallas_src>
import functools

import jax
import jax.numpy as jnp
from jax.experimental import pallas as pl
from jax.experimental.pallas import tpu as pltpu

NOISE_VARIANCE_EXPONENTIAL_LAMBDA = 10.0  # prior hyperparam (not used in fwd math)
SOFTPLUS_THRESHOLD = 20.0                 # PyTorch nn.Softplus threshold
_OUT_LANES = 128                          # lane-dense packed output width


def _head_kernel(kmask_ref, dmask_ref, raw_ref, out_ref, *,
                 beta, inv_beta, scale_a, lower_bound):
    # --- get_n_base_kernels: single reduce over flattened (D*Nk) lane axis ----
    kmask = kmask_ref[...].astype(jnp.float32)                 # (tb, D*Nk)
    nk = jnp.sum(kmask, axis=1, keepdims=True)                 # (tb, 1)

    # --- get_n_dims: reduce over D --------------------------------------------
    dmask = dmask_ref[...].astype(jnp.float32)                 # (tb, D)
    nd = jnp.sum(dmask, axis=1, keepdims=True)                 # (tb, 1)

    # --- greater_than: scale_a * softplus_beta(x) + lower_bound ---------------
    x = raw_ref[...].astype(jnp.float32)                       # (tb, 1)
    bx = beta * x
    # PyTorch Softplus: linear above threshold. Clamp the exp argument so the
    # unselected branch of jnp.where never overflows to inf.
    sp = jnp.where(
        bx > SOFTPLUS_THRESHOLD,
        x,
        jnp.log1p(jnp.exp(jnp.minimum(bx, SOFTPLUS_THRESHOLD))) * inv_beta)
    noise = scale_a * sp + lower_bound                         # (tb, 1)

    # --- pack all three results into one lane-dense output slab ---------------
    tb, lanes = out_ref.shape
    lane = jax.lax.broadcasted_iota(jnp.int32, (tb, lanes), 1)
    packed = jnp.where(lane == 0, nk,
             jnp.where(lane == 1, nd,
             jnp.where(lane == 2, noise, 0.0)))
    out_ref[...] = packed


def _choose_batch_tile(B: int) -> int:
    """Full batch for small B; otherwise a multiple-of-8 tile that divides B."""
    if B <= 512:
        return B
    for tb in (512, 256, 128, 64, 32, 16, 8):
        if B % tb == 0:
            return tb
    return B


def noise_variance_head(kernel_mask, dim_mask, raw_noise, *,
                        noise_variance_lower_bound=1e-4,
                        use_scaled_softplus=True):
    """Returns (n_base_kernels (B,1), n_dims (B,1), noise_variance (B,1))."""
    B, D, Nk = kernel_mask.shape
    assert dim_mask.shape == (B, D)
    assert raw_noise.shape == (B, 1)

    # Free contiguous reshape; keep native dtype (no f32 upcast -> smaller DMA).
    kmask_flat = kernel_mask.reshape(B, D * Nk)
    dmask = dim_mask
    if kmask_flat.dtype == jnp.bool_:      # bool blocks lower poorly; widen host-side
        kmask_flat = kmask_flat.astype(jnp.float32)
    if dmask.dtype == jnp.bool_:
        dmask = dmask.astype(jnp.float32)

    if use_scaled_softplus:
        beta, scale_a = 2.0, 0.1
    else:
        beta, scale_a = 1.0, 1.0

    kernel = functools.partial(
        _head_kernel,
        beta=beta,
        inv_beta=1.0 / beta,
        scale_a=scale_a,
        lower_bound=noise_variance_lower_bound,
    )

    tb = _choose_batch_tile(B)
    grid = (pl.cdiv(B, tb),)
    DNk = D * Nk

    packed = pl.pallas_call(
        kernel,
        out_shape=jax.ShapeDtypeStruct((B, _OUT_LANES), jnp.float32),
        grid=grid,
        in_specs=[
            pl.BlockSpec((tb, DNk), lambda b: (b, 0)),
            pl.BlockSpec((tb, D), lambda b: (b, 0)),
            pl.BlockSpec((tb, 1), lambda b: (b, 0)),
        ],
        out_specs=pl.BlockSpec((tb, _OUT_LANES), lambda b: (b, 0)),
        compiler_params=pltpu.CompilerParams(
            dimension_semantics=("parallel",)),   # shards batch across v7x's 2 TCs
    )(kmask_flat, dmask, raw_noise)

    n_kernels = packed[:, 0:1]
    n_dims = packed[:, 1:2]
    noise_var = packed[:, 2:3]
    return n_kernels, n_dims, noise_var


if __name__ == "__main__":
    key = jax.random.PRNGKey(0)
    B, D, Nk, d_h, hidden = 2, 4, 8, 32, 32

    k1, k2, k3, k4, k5 = jax.random.split(key, 5)
    # kernel_embeddings / dimwise encoding are part of the forward signature but
    # unused by the base class' concrete math; built here for shape fidelity.
    kernel_embeddings = jax.random.normal(k1, (B, D, Nk, d_h), jnp.float32)
    dimwise_dataset_encoding = jax.random.normal(k2, (B, D, hidden), jnp.float32)
    kernel_mask = (jax.random.uniform(k3, (B, D, Nk)) > 0.5).astype(jnp.float32)
    dim_mask = (jax.random.uniform(k4, (B, D)) > 0.3).astype(jnp.float32)
    raw_noise = jax.random.normal(k5, (B, 1), jnp.float32)  # pre-activation noise scalar

    n_kernels, n_dims, noise_var = noise_variance_head(
        kernel_mask, dim_mask, raw_noise,
        noise_variance_lower_bound=1e-4,
        use_scaled_softplus=True,
    )
    jax.block_until_ready((n_kernels, n_dims, noise_var))

    # Pure-JAX reference check of the concrete methods.
    ref_nk = jnp.sum(kernel_mask, axis=(1, 2))[:, None]
    ref_nd = jnp.sum(dim_mask, axis=1)[:, None]
    beta, a, lb = 2.0, 0.1, 1e-4
    bx = beta * raw_noise
    ref_noise = a * jnp.where(bx > 20.0, raw_noise,
                              jnp.log1p(jnp.exp(jnp.minimum(bx, 20.0))) / beta) + lb
    assert jnp.allclose(n_kernels, ref_nk, atol=1e-6)
    assert jnp.allclose(n_dims, ref_nd, atol=1e-6)
    assert jnp.allclose(noise_var, ref_noise, atol=1e-6)

    print("KERNEL_OK")
</pallas_src>

<mosaic_0001>
module attributes {stable_mosaic.version = 11 : i64} {
  func.func @_head_kernel(%arg0: i32, %arg1: memref<2x32xf32, #tpu.memory_space<vmem>>, %arg2: memref<2x4xf32, #tpu.memory_space<vmem>>, %arg3: memref<2x1xf32, #tpu.memory_space<vmem>>, %arg4: memref<2x128xf32, #tpu.memory_space<vmem>>) attributes {dimension_semantics = [#tpu.dimension_semantics<parallel>], iteration_bounds = array<i64: 1>, scalar_prefetch = 0 : i64, scratch_operands = 0 : i64, tpu.core_type = #tpu.core_type<tc>, window_params = [{transform_indices = @transform_0, window_bounds = array<i64: 2, 32>}, {transform_indices = @transform_1, window_bounds = array<i64: 2, 4>}, {transform_indices = @transform_2, window_bounds = array<i64: 2, 1>}, {transform_indices = @transform_3, window_bounds = array<i64: 2, 128>}]} {
    %c0 = arith.constant 0 : index
    %c0_0 = arith.constant 0 : index
    %0 = vector.load %arg1[%c0, %c0_0] : memref<2x32xf32, #tpu.memory_space<vmem>>, vector<2x32xf32>
    %cst = arith.constant dense<0.000000e+00> : vector<2xf32>
    %1 = vector.multi_reduction <add>, %0, %cst [1] : vector<2x32xf32> to vector<2xf32>
    %2 = vector.shape_cast %1 : vector<2xf32> to vector<2x1xf32>
    %c0_1 = arith.constant 0 : index
    %c0_2 = arith.constant 0 : index
    %3 = vector.load %arg2[%c0_1, %c0_2] : memref<2x4xf32, #tpu.memory_space<vmem>>, vector<2x4xf32>
    %cst_3 = arith.constant dense<0.000000e+00> : vector<2xf32>
    %4 = vector.multi_reduction <add>, %3, %cst_3 [1] : vector<2x4xf32> to vector<2xf32>
    %5 = vector.shape_cast %4 : vector<2xf32> to vector<2x1xf32>
    %c0_4 = arith.constant 0 : index
    %c0_5 = arith.constant 0 : index
    %6 = vector.load %arg3[%c0_4, %c0_5] : memref<2x1xf32, #tpu.memory_space<vmem>>, vector<2x1xf32>
    %cst_6 = arith.constant 2.000000e+00 : f32
    %7 = vector.broadcast %cst_6 : f32 to vector<2x1xf32>
    %8 = arith.mulf %7, %6 : vector<2x1xf32>
    %cst_7 = arith.constant 2.000000e+01 : f32
    %9 = vector.broadcast %cst_7 : f32 to vector<2x1xf32>
    %10 = arith.cmpf ogt, %8, %9 : vector<2x1xf32>
    %cst_8 = arith.constant 2.000000e+01 : f32
    %11 = vector.broadcast %cst_8 : f32 to vector<2x1xf32>
    %12 = arith.minimumf %8, %11 : vector<2x1xf32>
    %13 = math.exp %12 : vector<2x1xf32>
    %14 = math.log1p %13 : vector<2x1xf32>
    %cst_9 = arith.constant 5.000000e-01 : f32
    %15 = vector.broadcast %cst_9 : f32 to vector<2x1xf32>
    %16 = arith.mulf %14, %15 : vector<2x1xf32>
    %17 = arith.select %10, %6, %16 : vector<2x1xi1>, vector<2x1xf32>
    %cst_10 = arith.constant 1.000000e-01 : f32
    %18 = vector.broadcast %cst_10 : f32 to vector<2x1xf32>
    %19 = arith.mulf %18, %17 : vector<2x1xf32>
    %cst_11 = arith.constant 9.99999974E-5 : f32
    %20 = vector.broadcast %cst_11 : f32 to vector<2x1xf32>
    %21 = arith.addf %19, %20 : vector<2x1xf32>
    %22 = tpu.iota {dimensions = array<i32: 1>} : vector<2x128xi32>
    %c0_i32 = arith.constant 0 : i32
    %23 = vector.broadcast %c0_i32 : i32 to vector<2x128xi32>
    %24 = arith.cmpi eq, %22, %23 : vector<2x128xi32>
    %c1_i32 = arith.constant 1 : i32
    %25 = vector.broadcast %c1_i32 : i32 to vector<2x128xi32>
    %26 = arith.cmpi eq, %22, %25 : vector<2x128xi32>
    %c2_i32 = arith.constant 2 : i32
    %27 = vector.broadcast %c2_i32 : i32 to vector<2x128xi32>
    %28 = arith.cmpi eq, %22, %27 : vector<2x128xi32>
    %cst_12 = arith.constant 0.000000e+00 : f32
    %29 = vector.shape_cast %21 : vector<2x1xf32> to vector<2x1xf32>
    %30 = vector.broadcast %29 : vector<2x1xf32> to vector<2x128xf32>
    %31 = vector.broadcast %cst_12 : f32 to vector<2x128xf32>
    %32 = arith.select %28, %30, %31 : vector<2x128xi1>, vector<2x128xf32>
    %33 = vector.shape_cast %5 : vector<2x1xf32> to vector<2x1xf32>
    %34 = vector.broadcast %33 : vector<2x1xf32> to vector<2x128xf32>
    %35 = arith.select %26, %34, %32 : vector<2x128xi1>, vector<2x128xf32>
    %36 = vector.shape_cast %2 : vector<2x1xf32> to vector<2x1xf32>
    %37 = vector.broadcast %36 : vector<2x1xf32> to vector<2x128xf32>
    %38 = arith.select %24, %37, %35 : vector<2x128xi1>, vector<2x128xf32>
    %c0_13 = arith.constant 0 : index
    %c0_14 = arith.constant 0 : index
    %39 = vector.load %arg4[%c0_13, %c0_14] : memref<2x128xf32, #tpu.memory_space<vmem>>, vector<2x128xf32>
    tpu.vector_store %arg4[%c0_13, %c0_14], %38 {strides = array<i32>} : memref<2x128xf32, #tpu.memory_space<vmem>>, vector<2x128xf32>,
    return
  }
  func.func @transform_0(%arg0: i32) -> (i32, i32) {
    %c0_i32 = arith.constant 0 : i32
    %c0_i32_0 = arith.constant 0 : i32
    return %arg0, %c0_i32 : i32, i32
  }
  func.func @transform_1(%arg0: i32) -> (i32, i32) {
    %c0_i32 = arith.constant 0 : i32
    %c0_i32_0 = arith.constant 0 : i32
    return %arg0, %c0_i32 : i32, i32
  }
  func.func @transform_2(%arg0: i32) -> (i32, i32) {
    %c0_i32 = arith.constant 0 : i32
    %c0_i32_0 = arith.constant 0 : i32
    return %arg0, %c0_i32 : i32, i32
  }
  func.func @transform_3(%arg0: i32) -> (i32, i32) {
    %c0_i32 = arith.constant 0 : i32
    %c0_i32_0 = arith.constant 0 : i32
    return %arg0, %c0_i32 : i32, i32
  }
}

</mosaic_0001>

<bundles_post_ra>
// kernel: tpu_custom_call.1
= control target key start
LH: loop header
LB: loop body
LE: loop exit
PB: predicated region body
PF: predicated region fallthrough
CT: control target
= control target key end

     0   :  { %vm21_vm0 = vcmask 25600   ;;  %vm16_vm1 = vcmask 254976   ;;  %v104_v4 = vmov 0   ;;  %s147_s0 = inlined_call_operand.vmem [shape: f32[2,32], index: 0, kind: input, shape index: {}]   ;;  %s148_s1 = inlined_call_operand.vmem [shape: f32[2,4], index: 1, kind: input, shape index: {}]   ;;  %s149_s2 = inlined_call_operand.vmem [shape: f32[2,1], index: 2, kind: input, shape index: {}]   ;;  %s150_s3 = inlined_call_operand.hbm [shape: f32[2,128], index: 3, kind: output, shape index: {}]  }
   0x1   :  { %v20_v0 = vld [vmem:[%s148_s1] sm:$0x3]  ;;  %74 = vset.pattern.permute.xlu1 %v104_v4 }
   0x2   :  { %v15_v1 = vld [vmem:[%s147_s0] sm:$0x3]  ;;  %v22_v2 = vsel %vm21_vm0, %v20_v0, 0.0 }
   0x3   :  { %v25_v3 = vld [vmem:[%s149_s2] sm:$0x3]  ;;  %23 = vadd.xlane.f32.xlu0 %v22_v2 }
   0x4   :  { %v26_v5 = vmul.f32 2.0, %v25_v3 }
   0x5   :  { %8 = vsyncpa [#allocation3], 0  ;;  %v17_v6 = vsel %vm16_vm1, %v15_v1, 0.0  ;;  %75 = vset.pattern.permute.xlu0 %v104_v4  ;;  %v44_v22 = vlaneseq  ;;  %s105_s0 = smov [#allocation2]  }
   0x6   :  { %v28_v7 = vmin.f32 %v26_v5, 20.0  ;;  %vm27_vm3 = vcmp.gt.f32.partialorder %v26_v5, 20.0  ;;  %s64_s1 = sshll.u32 %s105_s0, 4  ;;  %s65_s1 = int_to_ptr.vmem [resolvable:$true] %s64_s1 }
   0x7   :  { %18 = vadd.xlane.f32.xlu0 %v17_v6  ;;  %v45_v24 = vand.u32 127, %v44_v22  ;;  %s80_s2 = scalar_lea.vmem %s65_s1, 32  ;;  %p85_p1 = scmp.lt.s32.totalorder %s65_s1, %s65_s1 }
   0x8   :  { %v29_v8 = vmul.f32 1.442695, %v28_v7  ;;  %p81_p0 = scmp.ne.s32.totalorder %s65_s1, %s80_s2  ;;  %p86_p2 = scmp.lt.s32.totalorder %s80_s2, %s80_s2 }
   0x9   :  { %vm48_vm4 = vcmp.eq.s32.totalorder %v45_v24, 2  ;;  %vm47_vm5 = vcmp.eq.s32.totalorder %v45_v24, 1  ;;  %vm46_vm6 = vcmp.eq.s32.totalorder %v45_v24, 0 }
   0xa   :  { %76 = vpow2.f32 %v29_v8  ;;  %p87_p3 = por %p86_p2, %p85_p1 }
   0xc   :  { %p88_p4 = pnand %p87_p3, %p81_p0 }
  0x14   :  { %v77_v9 = vpop.eup %76 }
  0x15   :  { %v31_v10 = vadd.f32 1.0, %v77_v9  ;;  %v34_v11 = vmul.f32 -0.5, %v77_v9  ;;  %v37_v13 = vand.u32 2147483647, %v77_v9 }
  0x17   :  { %78 = vlog2.f32 %v31_v10  ;;  %v35_v12 = vadd.f32 1.0, %v34_v11  ;;  %vm38_vm2 = vcmp.lt.f32.partialorder %v37_v13, 0.0004427343 }
  0x19   :  { %v36_v14 = vmul.f32 %v77_v9, %v35_v12 }
  0x21   :  { %v79_v15 = vpop.eup %78 }
  0x22   :  { %v33_v16 = vmul.f32 0.6931472, %v79_v15 }
  0x24   :  { %v39_v17 = vsel %vm38_vm2, %v36_v14, %v33_v16 }
  0x25   :  { %v40_v18 = vmul.f32 0.5, %v39_v17 }
  0x27   :  { %v41_v19 = vsel %vm27_vm3, %v25_v3, %v40_v18 }
  0x28   :  { %v42_v20 = vmul.f32 0.1, %v41_v19 }
  0x2a   :  { %v43_v21 = vadd.f32 0.0001, %v42_v20 }
  0x2c   :  { %51 = vperm.xlu1 %74, %v43_v21  }
  0x90   :  { %v24_v23 = vpop.xlane.xlu0 %23 }
  0x94   :  { %v19_v26 = vpop.xlane.xlu0 %18 }
  0xab   :  { %v52_v25 = vpop.permute.xlu1 %51 }
  0xac   :  { %v54_v27 = vsel %vm48_vm4, %v52_v25, 0.0 }
  0xad   :  { %v55_v28 = vsel %vm47_vm5, %v24_v23, %v54_v27 }
  0xae   :  { %v56_v29 = vsel %vm46_vm6, %v19_v26, %v55_v28 }
  0xaf   :  { %57 = vst [vmem:[#allocation2] sm:$0x3] %v56_v29 }
  0xb0   :  { %91 = shalt.err (!%p88_p4)
}
  0xb1   :  { %s92_s20 = scalar_lea.hbm %s150_s3, 32 }
  0xb2   :  { %p93_p5 = scmp.ne.s32.totalorder %s150_s3, %s92_s20  ;;  %p96_p6 = scmp.lt.u32.totalorder %s92_s20, %s150_s3 }
  0xb4   :  { %p98_p7 = pnand %p96_p6, %p93_p5 }
  0xb6   :  { %101 = shalt.err (!%p98_p7)
}
  0xb7   :  { %67 = dma.vmem_to_hbm [thread:$0]  %s65_s1, 32, %s150_s3, [#allocation3]  }
  0xb8   :  { %102 = dma.done.wait [#allocation3], 32  }
  0xb9   :  { %103 = vsyncadd [#allocation3], 4294967264 }
  0xba   :  { %71 = vsyncpa [#allocation3], 1 }

</bundles_post_ra>
